<compile_context>
chip_gen: v5e
topology: v5e:2x2
jax: 0.10.0
libtpu: 0.0.40
codegen_flags: <defaults>
</compile_context>

<pallas_src>
import jax
import jax.numpy as jnp
from jax.experimental import pallas as pl
from jax.experimental.pallas import tpu as pltpu

INPUT_SIZE = 16
HIDDEN_SIZE = 128
NUM_CLASSES = 3
OUT_PAD = 8            # narrow padded logits width (3 -> 8): 32 B/row f32 HBM writes
DEFAULT_TILE_B = 8192  # ~8 MiB live set; fits v7x 64 MiB/TC, amortizes grid-step overhead


def _round_up(x, m):
    return ((x + m - 1) // m) * m


def mlp_kernel(x_ref, w1_ref, b1_ref, w2_ref, b2_ref, out_ref):
    # x_ref:  [tb, 16]   f32   (streamed, double-buffered; bf16 cast here, hidden under DMA)
    # w1_ref: [16, 128]  bf16  (resident: constant index_map)
    # b1_ref: [1, 128]   f32   (resident)
    # w2_ref: [128, 8]   bf16  (resident, zero-padded past column 3)
    # b2_ref: [1, 8]     f32   (resident, zero-padded past column 3)
    # out_ref:[tb, 8]    f32   (narrow store; wrapper slices [:, :3])
    xb = x_ref[...].astype(jnp.bfloat16)
    h = jnp.dot(xb, w1_ref[...], preferred_element_type=jnp.float32)
    h = jnp.maximum(h + b1_ref[...], 0.0)               # bias + ReLU in f32 (VPU)
    hb = h.astype(jnp.bfloat16)
    y = jnp.dot(hb, w2_ref[...], preferred_element_type=jnp.float32) + b2_ref[...]
    out_ref[...] = y


def mlp_forward(x, w1, b1, w2, b2, *, tile_b=DEFAULT_TILE_B):
    """x: [B, 16] f32. w1: [16,128], b1: [1,128], w2: [128,3], b2: [1,3]. Returns [B, 3] f32."""
    B = x.shape[0]

    # Parameters are tiny and resident in VMEM: one-time wrapper-side cast/pad is free.
    w1_b = w1.astype(jnp.bfloat16)
    w2_p = (jnp.zeros((HIDDEN_SIZE, OUT_PAD), jnp.float32)
            .at[:, :NUM_CLASSES].set(w2).astype(jnp.bfloat16))
    b2_p = jnp.zeros((1, OUT_PAD), jnp.float32).at[:, :NUM_CLASSES].set(b2.reshape(1, NUM_CLASSES))
    b1_p = b1.reshape(1, HIDDEN_SIZE).astype(jnp.float32)

    # Batch tile: multiple of 8 (f32 sublane), capped so the grid has >= 2 steps when
    # possible (both TCs get work on v7x). Pallas handles the ragged last block, so the
    # streamed input is neither padded nor cast in the wrapper (no extra HBM passes).
    tb = min(tile_b, _round_up(pl.cdiv(B, 2), 16), _round_up(B, 8))
    tb = max(tb, 8)
    grid = (pl.cdiv(B, tb),)

    out = pl.pallas_call(
        mlp_kernel,
        out_shape=jax.ShapeDtypeStruct((B, OUT_PAD), jnp.float32),
        grid_spec=pltpu.PrefetchScalarGridSpec(
            num_scalar_prefetch=0,
            grid=grid,
            in_specs=[
                # Streamed per-step x tile (default double-buffering).
                pl.BlockSpec((tb, INPUT_SIZE), lambda i: (i, 0)),
                # Grid-invariant (resident) weights / biases.
                pl.BlockSpec((INPUT_SIZE, HIDDEN_SIZE), lambda i: (0, 0)),
                pl.BlockSpec((1, HIDDEN_SIZE), lambda i: (0, 0)),
                pl.BlockSpec((HIDDEN_SIZE, OUT_PAD), lambda i: (0, 0)),
                pl.BlockSpec((1, OUT_PAD), lambda i: (0, 0)),
            ],
            out_specs=pl.BlockSpec((tb, OUT_PAD), lambda i: (i, 0)),
        ),
        compiler_params=pltpu.CompilerParams(
            dimension_semantics=("parallel",),   # shard batch steps across TCs (v7x megacore)
            vmem_limit_bytes=32 * 1024 * 1024,   # live set <= ~8 MiB at tb=8192; safe on 64 MiB/TC
        ),
    )(x, w1_b, b1_p, w2_p, b2_p)

    # Narrow (B, 8) -> (B, 3): trivial compared to the old (B, 128) f32 slab re-read.
    return out[:, :NUM_CLASSES]


def init_params(key):
    # Deterministic init mimicking nn.Linear's U(-1/sqrt(fan_in), 1/sqrt(fan_in)).
    k1, k2, k3, k4 = jax.random.split(key, 4)
    bound1 = 1.0 / jnp.sqrt(INPUT_SIZE)
    bound2 = 1.0 / jnp.sqrt(HIDDEN_SIZE)
    w1 = jax.random.uniform(k1, (INPUT_SIZE, HIDDEN_SIZE), jnp.float32, -bound1, bound1)
    b1 = jax.random.uniform(k2, (1, HIDDEN_SIZE), jnp.float32, -bound1, bound1)
    w2 = jax.random.uniform(k3, (HIDDEN_SIZE, NUM_CLASSES), jnp.float32, -bound2, bound2)
    b2 = jax.random.uniform(k4, (1, NUM_CLASSES), jnp.float32, -bound2, bound2)
    return w1, b1, w2, b2


def _reference(x, w1, b1, w2, b2):
    # Reference with the same bf16 operand quantization the kernel performs (f32 accumulation).
    xq = x.astype(jnp.bfloat16).astype(jnp.float32)
    w1q = w1.astype(jnp.bfloat16).astype(jnp.float32)
    h = jnp.maximum(xq @ w1q + b1, 0.0)
    hq = h.astype(jnp.bfloat16).astype(jnp.float32)
    w2q = w2.astype(jnp.bfloat16).astype(jnp.float32)
    return hq @ w2q + b2


if __name__ == "__main__":
    key = jax.random.PRNGKey(0)
    kx, kp = jax.random.split(key)
    w1, b1, w2, b2 = init_params(kp)

    # Small sanity test (B=8, single grid step).
    B = 8
    x = jax.random.normal(kx, (B, INPUT_SIZE), jnp.float32)
    out = mlp_forward(x, w1, b1, w2, b2)
    jax.block_until_ready(out)
    ref = _reference(x, w1, b1, w2, b2)
    assert out.shape == (B, NUM_CLASSES)
    assert jnp.allclose(out, ref, atol=1e-3, rtol=1e-3)

    # Multi-tile test: B not divisible by the tile, grid > 1, ragged last block.
    B2 = 200
    x2 = jax.random.normal(jax.random.fold_in(kx, 1), (B2, INPUT_SIZE), jnp.float32)
    out2 = mlp_forward(x2, w1, b1, w2, b2, tile_b=64)
    jax.block_until_ready(out2)
    ref2 = _reference(x2, w1, b1, w2, b2)
    assert out2.shape == (B2, NUM_CLASSES)
    assert jnp.allclose(out2, ref2, atol=1e-3, rtol=1e-3)

    print("KERNEL_OK")
</pallas_src>

<mosaic_0001>
module attributes {stable_mosaic.version = 11 : i64} {
  func.func @mlp_kernel(%arg0: i32, %arg1: memref<8x16xf32, #tpu.memory_space<vmem>>, %arg2: memref<16x128xbf16, #tpu.memory_space<vmem>>, %arg3: memref<1x128xf32, #tpu.memory_space<vmem>>, %arg4: memref<128x8xbf16, #tpu.memory_space<vmem>>, %arg5: memref<1x8xf32, #tpu.memory_space<vmem>>, %arg6: memref<8x8xf32, #tpu.memory_space<vmem>>) attributes {dimension_semantics = [#tpu.dimension_semantics<parallel>], iteration_bounds = array<i64: 1>, scalar_prefetch = 0 : i64, scratch_operands = 0 : i64, tpu.core_type = #tpu.core_type<tc>, window_params = [{transform_indices = @transform_0, window_bounds = array<i64: 8, 16>}, {pipeline_mode = #tpu.pipeline_mode<synchronous>, transform_indices = @transform_1, window_bounds = array<i64: 16, 128>}, {pipeline_mode = #tpu.pipeline_mode<synchronous>, transform_indices = @transform_2, window_bounds = array<i64: 1, 128>}, {pipeline_mode = #tpu.pipeline_mode<synchronous>, transform_indices = @transform_3, window_bounds = array<i64: 128, 8>}, {pipeline_mode = #tpu.pipeline_mode<synchronous>, transform_indices = @transform_4, window_bounds = array<i64: 1, 8>}, {transform_indices = @transform_5, window_bounds = array<i64: 8, 8>}]} {
    %c0 = arith.constant 0 : index
    %c0_0 = arith.constant 0 : index
    %0 = vector.load %arg1[%c0, %c0_0] : memref<8x16xf32, #tpu.memory_space<vmem>>, vector<8x16xf32>
    %1 = arith.truncf %0 : vector<8x16xf32> to vector<8x16xbf16>
    %c0_1 = arith.constant 0 : index
    %c0_2 = arith.constant 0 : index
    %2 = vector.load %arg2[%c0_1, %c0_2] : memref<16x128xbf16, #tpu.memory_space<vmem>>, vector<16x128xbf16>
    %cst = arith.constant dense<0.000000e+00> : vector<8x128xf32>
    %3 = tpu.matmul %1, %2, %cst {dimension_numbers = #tpu.dot_dimension_numbers<[1], [0], [0], [1], [0, 0, 1, 1], [], []>} : vector<8x16xbf16>, vector<16x128xbf16>, vector<8x128xf32> -> vector<8x128xf32>
    %c0_3 = arith.constant 0 : index
    %c0_4 = arith.constant 0 : index
    %4 = vector.load %arg3[%c0_3, %c0_4] : memref<1x128xf32, #tpu.memory_space<vmem>>, vector<1x128xf32>
    %5 = vector.broadcast %4 : vector<1x128xf32> to vector<8x128xf32>
    %6 = arith.addf %3, %5 : vector<8x128xf32>
    %cst_5 = arith.constant 0.000000e+00 : f32
    %7 = vector.broadcast %cst_5 : f32 to vector<8x128xf32>
    %8 = arith.maximumf %6, %7 : vector<8x128xf32>
    %9 = arith.truncf %8 : vector<8x128xf32> to vector<8x128xbf16>
    %c0_6 = arith.constant 0 : index
    %c0_7 = arith.constant 0 : index
    %10 = vector.load %arg4[%c0_6, %c0_7] : memref<128x8xbf16, #tpu.memory_space<vmem>>, vector<128x8xbf16>
    %cst_8 = arith.constant dense<0.000000e+00> : vector<8x8xf32>
    %11 = tpu.matmul %9, %10, %cst_8 {dimension_numbers = #tpu.dot_dimension_numbers<[1], [0], [0], [1], [0, 0, 1, 1], [], []>} : vector<8x128xbf16>, vector<128x8xbf16>, vector<8x8xf32> -> vector<8x8xf32>
    %c0_9 = arith.constant 0 : index
    %c0_10 = arith.constant 0 : index
    %12 = vector.load %arg5[%c0_9, %c0_10] : memref<1x8xf32, #tpu.memory_space<vmem>>, vector<1x8xf32>
    %13 = vector.broadcast %12 : vector<1x8xf32> to vector<8x8xf32>
    %14 = arith.addf %11, %13 : vector<8x8xf32>
    %c0_11 = arith.constant 0 : index
    %c0_12 = arith.constant 0 : index
    %15 = vector.load %arg6[%c0_11, %c0_12] : memref<8x8xf32, #tpu.memory_space<vmem>>, vector<8x8xf32>
    tpu.vector_store %arg6[%c0_11, %c0_12], %14 {strides = array<i32>} : memref<8x8xf32, #tpu.memory_space<vmem>>, vector<8x8xf32>,
    return
  }
  func.func @transform_0(%arg0: i32) -> (i32, i32) {
    %c0_i32 = arith.constant 0 : i32
    %c0_i32_0 = arith.constant 0 : i32
    return %arg0, %c0_i32 : i32, i32
  }
  func.func @transform_1(%arg0: i32) -> (i32, i32) {
    %c0_i32 = arith.constant 0 : i32
    %c0_i32_0 = arith.constant 0 : i32
    %c0_i32_1 = arith.constant 0 : i32
    return %c0_i32, %c0_i32_0 : i32, i32
  }
  func.func @transform_2(%arg0: i32) -> (i32, i32) {
    %c0_i32 = arith.constant 0 : i32
    %c0_i32_0 = arith.constant 0 : i32
    %c0_i32_1 = arith.constant 0 : i32
    return %c0_i32, %c0_i32_0 : i32, i32
  }
  func.func @transform_3(%arg0: i32) -> (i32, i32) {
    %c0_i32 = arith.constant 0 : i32
    %c0_i32_0 = arith.constant 0 : i32
    %c0_i32_1 = arith.constant 0 : i32
    return %c0_i32, %c0_i32_0 : i32, i32
  }
  func.func @transform_4(%arg0: i32) -> (i32, i32) {
    %c0_i32 = arith.constant 0 : i32
    %c0_i32_0 = arith.constant 0 : i32
    %c0_i32_1 = arith.constant 0 : i32
    return %c0_i32, %c0_i32_0 : i32, i32
  }
  func.func @transform_5(%arg0: i32) -> (i32, i32) {
    %c0_i32 = arith.constant 0 : i32
    %c0_i32_0 = arith.constant 0 : i32
    return %arg0, %c0_i32 : i32, i32
  }
}

</mosaic_0001>

<bundles_post_ra>
// kernel: tpu_custom_call.1
= control target key start
LH: loop header
LB: loop body
LE: loop exit
PB: predicated region body
PF: predicated region fallthrough
CT: control target
= control target key end

     0   :  { %vm36_vm0 = vcmask 130048   ;;  %s299_s0 = inlined_call_operand.vmem [shape: f32[8,16], index: 0, kind: input, shape index: {}]   ;;  %s300_s1 = inlined_call_operand.vmem [shape: bf16[16,128], index: 1, kind: input, shape index: {}]   ;;  %s301_s2 = inlined_call_operand.vmem [shape: f32[1,128], index: 2, kind: input, shape index: {}]   ;;  %s302_s3 = inlined_call_operand.vmem [shape: bf16[128,8], index: 3, kind: input, shape index: {}]   ;;  %s303_s4 = inlined_call_operand.vmem [shape: f32[1,8], index: 4, kind: input, shape index: {}]   ;;  %s304_s5 = inlined_call_operand.hbm [shape: f32[8,8], index: 5, kind: output, shape index: {}]  }
   0x1   :  { %v191_v0 = vld [vmem:[%s300_s1] sm:$0xff]  ;;  %v199_v2 = vld [vmem:[%s302_s3 + $0x38] sm:$0xff]  ;;  %v198_v4 = vld [vmem:[%s302_s3 + $0x30] sm:$0xff] }
   0x2   :  { %v22_v1 = vld [vmem:[%s299_s0] sm:$0xff]  ;;  %47 = vmatpush.bf16.msra.mxu0 %v191_v0  ;;  %123 = vmatpush.bf16.msra.mxu1 %v199_v2 }
   0x3   :  { %v23_v3 = vpack.c.bf16 %v22_v1, %v22_v1 }
   0x4   :  { %10 = vsyncpa [#allocation3], 0  ;;  %v197_v5 = vld [vmem:[%s302_s3 + $0x28] sm:$0xff]  ;;  %v196_v6 = vld [vmem:[%s302_s3 + $0x20] sm:$0xff]  ;;  %s229_s15 = smov [#allocation2]   ;;  %vm136_vm1 = vcmask 64512  }
   0x5   :  { %158 = vmatmul.msk.bf16.vlgmr.msra.gmra.mxu0 %vm36_vm0, %v23_v3  ;;  %v195_v7 = vld [vmem:[%s302_s3 + $0x18] sm:$0xff]  ;;  %v194_v8 = vld [vmem:[%s302_s3 + $0x10] sm:$0xff]  ;;  %v193_v9 = vld [vmem:[%s302_s3 + $0x8] sm:$0xff]  ;;  %s143_s16 = sshll.u32 %s229_s15, 4  ;;  %s144_s16 = int_to_ptr.vmem [resolvable:$true] %s143_s16 }
   0x6   :  { %124 = vmatpush.bf16.msra.mxu1 %v198_v4  ;;  %v192_v10 = vld [vmem:[%s302_s3] sm:$0xff]  ;;  %s145_s3 = sshll.u32 %s304_s5, 4  ;;  %s146_s3 = int_to_ptr.hbm [resolvable:$true] %s145_s3 }
   0x7   :  { %v201_v11 = vld [vmem:[%s301_s2] ss:$0 sm:$0xff] }
   0x8   :  { %v202_v17 = vld [vmem:[%s303_s4] ss:$0 sm:$0xff] }
   0xa   :  { %125 = vmatpush.bf16.msra.mxu1 %v197_v5 }
   0xe   :  { %126 = vmatpush.bf16.msra.mxu1 %v196_v6 }
  0x12   :  { %127 = vmatpush.bf16.msra.mxu1 %v195_v7 }
  0x16   :  { %128 = vmatpush.bf16.msra.mxu1 %v194_v8 }
  0x1a   :  { %129 = vmatpush.bf16.msra.mxu1 %v193_v9 }
  0x1e   :  { %130 = vmatpush.bf16.msra.mxu1 %v192_v10 }
  0x82   :  { %v49_v12 = vpop.f32.mrf.mxu0 }
  0x83   :  { %v50_v13 = vadd.f32 %v201_v11, %v49_v12 }
  0x85   :  { %v53_v14 = vmax.f32 %v50_v13, 0.0 }
  0x87   :  { %v54_v15 = vpack.c.bf16 %v53_v14, %v53_v14 }
  0x89   :  { %131 = vmatmul.bf16.vlgmr.msra.gmra.mxu1 %v54_v15 }
  0x8a   :  { %v51_v16 = vpop.f32.mrf.mxu0 }
 0x106   :  { %v132_v18 = vpop.f32.mrf.mxu1 }
 0x107   :  { %v133_v19 = vadd.f32 %v202_v17, %v132_v18 }
 0x109   :  { %137 = vst.msk [vmem:[#allocation2] sm:$0xff] %vm136_vm1, %v133_v19 }
 0x10a   :  { %148 = dma.vmem_to_hbm [thread:$0]  %s144_s16, 128, %s146_s3, [#allocation3]  }
 0x10e   :  { %v134_v20 = vpop.f32.mrf.mxu1 }
 0x10f   :  { %227 = dma.done.wait [#allocation3], 128  }
 0x110   :  { %228 = vsyncadd [#allocation3], 4294967168 }
 0x111   :  { %153 = vsyncpa [#allocation3], 1 }

</bundles_post_ra>
